<compile_context>
chip_gen: v7x
topology: tpu7x:2x2x1
jax: 0.10.0
libtpu: 0.0.40
codegen_flags: <defaults>
</compile_context>

<pallas_src>
import jax
import jax.numpy as jnp
from jax import lax
from jax.experimental import pallas as pl
from jax.experimental.pallas import tpu as pltpu

_IMAGE_SIZE = 784
_PAD = 128            # lane-dense padded width for every hidden / output layer
_NUM_CLASSES = 10
_NEG_BIG = -1e30      # finite "-inf" for masking padded logit columns


def _mlp_kernel(x_ref,
                w0_ref, b0_ref, w1_ref, b1_ref, w2_ref, b2_ref,
                w3_ref, b3_ref, w4_ref, b4_ref, w5_ref, b5_ref,
                out_ref):
    def dense_sigmoid(h_bf16, w_ref, b_ref):
        # bf16 x bf16 matmul with f32 accumulation on the MXU; bias add,
        # sigmoid and everything downstream stay f32.
        z = jnp.dot(h_bf16, w_ref[...],
                    preferred_element_type=jnp.float32) + b_ref[...]
        # sigmoid(z) == 0.5 * (tanh(z/2) + 1): tanh runs on the EUP slot,
        # avoiding the multi-instruction VALU reciprocal sequence.
        return 0.5 * (jnp.tanh(0.5 * z) + 1.0)

    h = x_ref[...]                                          # (TB, 784) bf16
    a = dense_sigmoid(h, w0_ref, b0_ref)                    # (TB, 128) f32
    a = dense_sigmoid(a.astype(jnp.bfloat16), w1_ref, b1_ref)   # true width 64
    a = dense_sigmoid(a.astype(jnp.bfloat16), w2_ref, b2_ref)   # true width 10
    a = dense_sigmoid(a.astype(jnp.bfloat16), w3_ref, b3_ref)
    a = dense_sigmoid(a.astype(jnp.bfloat16), w4_ref, b4_ref)
    a = dense_sigmoid(a.astype(jnp.bfloat16), w5_ref, b5_ref)   # (TB, 128) f32

    # log_softmax over the 10 real classes: mask the 118 padded columns.
    # Padded weight columns / biases are zero, so padded sigmoid outputs are
    # exactly 0.5 and contribute nothing to the next layer (zero weight rows);
    # here they must be masked so they do not pollute the normalizer.
    col = lax.broadcasted_iota(jnp.int32, a.shape, 1)
    logits = jnp.where(col < _NUM_CLASSES, a, _NEG_BIG)
    m = jnp.max(logits, axis=-1, keepdims=True)
    shifted = logits - m
    lse = jnp.log(jnp.sum(jnp.exp(shifted), axis=-1, keepdims=True))
    out_ref[...] = (shifted - lse).astype(out_ref.dtype)    # lane-dense store


def _round_up(n, m):
    return (n + m - 1) // m * m


def _pad_linear(w, b, in_pad):
    """Zero-pad (in, out) weight -> bf16 (in_pad, 128), bias -> f32 (1, 128)."""
    wi, wo = w.shape
    wp = jnp.zeros((in_pad, _PAD), jnp.float32).at[:wi, :wo].set(
        w.astype(jnp.float32)).astype(jnp.bfloat16)
    bp = jnp.zeros((1, _PAD), jnp.float32).at[:, :wo].set(
        b.reshape(1, -1).astype(jnp.float32))
    return wp, bp


def model_f_forward(x, params, *, tb_max=4096):
    """params: 6 pairs (w, b), w stored (in_features, out_features).

    Returns (B, 10) log-probabilities, matching Model_F.forward in eval mode.
    """
    # bf16 input halves the dominant HBM read (the 784-wide activations).
    x2d = x.reshape(-1, _IMAGE_SIZE).astype(jnp.bfloat16)
    B = x2d.shape[0]

    # Balanced batch tiling: choose the number of steps first, then size TB so
    # padding waste is bounded by <16 rows per step (bf16 sublane packing
    # wants multiples of 16 on the second-minor dim).
    nsteps = -(-B // tb_max)
    TB = _round_up(-(-B // nsteps), 16)
    B_pad = nsteps * TB
    if B_pad != B:
        x2d = jnp.pad(x2d, ((0, B_pad - B), (0, 0)))

    in_dims = (_IMAGE_SIZE, _PAD, _PAD, _PAD, _PAD, _PAD)
    flat_params = []
    for (w, b), in_pad in zip(params, in_dims):
        wp, bp = _pad_linear(w, b, in_pad)
        flat_params += [wp, bp]

    grid = (B_pad // TB,)
    x_spec = pl.BlockSpec((TB, _IMAGE_SIZE), lambda i: (i, 0))
    out_spec = pl.BlockSpec((TB, _PAD), lambda i: (i, 0))
    # Constant index_map -> each parameter is DMA'd once and stays resident.
    param_specs = [pl.BlockSpec(p.shape, lambda i: (0, 0)) for p in flat_params]

    weight_bytes = sum(int(p.size) * p.dtype.itemsize for p in flat_params)
    cost = pl.CostEstimate(
        flops=2 * B_pad * (_IMAGE_SIZE * _PAD + 5 * _PAD * _PAD),
        transcendentals=B_pad * (6 * _PAD + _PAD),     # tanh sigmoids + softmax exp
        bytes_accessed=(B_pad * _IMAGE_SIZE * 2          # bf16 input
                        + B_pad * _PAD * 4               # f32 output slab
                        + weight_bytes),
    )

    out_padded = pl.pallas_call(
        _mlp_kernel,
        out_shape=jax.ShapeDtypeStruct((B_pad, _PAD), jnp.float32),
        grid=grid,
        in_specs=[x_spec] + param_specs,
        out_specs=out_spec,
        compiler_params=pltpu.CompilerParams(
            dimension_semantics=("parallel",),
            # TB=4096 bf16: ~13 MiB x double-buffer + ~4 MiB out + <1 MiB
            # weights + intermediate scratch; 48 MiB is above the 16/32 MiB
            # defaults yet leaves headroom on v7x's 64 MiB physical VMEM.
            vmem_limit_bytes=48 << 20,
        ),
        cost_estimate=cost,
    )(x2d, *flat_params)

    return out_padded[:B, :_NUM_CLASSES]


def init_params(key):
    """Deterministic init mimicking PyTorch nn.Linear default U(-1/sqrt(fan_in), +)."""
    sizes = [(_IMAGE_SIZE, 128), (128, 64), (64, 10), (10, 10), (10, 10), (10, 10)]
    keys = jax.random.split(key, len(sizes))
    params = []
    for k, (fan_in, fan_out) in zip(keys, sizes):
        kw, kb = jax.random.split(k)
        bound = 1.0 / float(fan_in) ** 0.5
        w = jax.random.uniform(kw, (fan_in, fan_out), jnp.float32, -bound, bound)
        b = jax.random.uniform(kb, (fan_out,), jnp.float32, -bound, bound)
        params.append((w, b))
    return tuple(params)


def _ref_forward(x, params):
    h = x.reshape(-1, _IMAGE_SIZE).astype(jnp.float32)
    for w, b in params:
        h = jax.nn.sigmoid(h @ w + b)
    return jax.nn.log_softmax(h, axis=-1)


if __name__ == "__main__":
    key = jax.random.PRNGKey(0)
    kx, kp = jax.random.split(key)

    # Small MNIST-like input: batch=8, 1x28x28 images (flattened to 784 inside).
    x = jax.random.normal(kx, (8, 1, 28, 28), dtype=jnp.float32)
    params = init_params(kp)

    out = model_f_forward(x, params)
    jax.block_until_ready(out)

    ref = _ref_forward(x, params)
    assert out.shape == (8, _NUM_CLASSES)
    # Normalization is done in f32 inside the kernel -> should be near-exact.
    assert jnp.allclose(jnp.sum(jnp.exp(out), axis=-1), 1.0, atol=1e-4)
    # bf16 matmul datapath vs. f32 reference: relaxed tolerance.
    assert jnp.allclose(out, ref, atol=5e-2, rtol=5e-2)
    print("KERNEL_OK")
</pallas_src>

<mosaic_0001>
module attributes {stable_mosaic.version = 11 : i64} {
  func.func @_mlp_kernel(%arg0: i32, %arg1: memref<16x784xbf16, #tpu.memory_space<vmem>>, %arg2: memref<784x128xbf16, #tpu.memory_space<vmem>>, %arg3: memref<1x128xf32, #tpu.memory_space<vmem>>, %arg4: memref<128x128xbf16, #tpu.memory_space<vmem>>, %arg5: memref<1x128xf32, #tpu.memory_space<vmem>>, %arg6: memref<128x128xbf16, #tpu.memory_space<vmem>>, %arg7: memref<1x128xf32, #tpu.memory_space<vmem>>, %arg8: memref<128x128xbf16, #tpu.memory_space<vmem>>, %arg9: memref<1x128xf32, #tpu.memory_space<vmem>>, %arg10: memref<128x128xbf16, #tpu.memory_space<vmem>>, %arg11: memref<1x128xf32, #tpu.memory_space<vmem>>, %arg12: memref<128x128xbf16, #tpu.memory_space<vmem>>, %arg13: memref<1x128xf32, #tpu.memory_space<vmem>>, %arg14: memref<16x128xf32, #tpu.memory_space<vmem>>) attributes {dimension_semantics = [#tpu.dimension_semantics<parallel>], iteration_bounds = array<i64: 1>, scalar_prefetch = 0 : i64, scratch_operands = 0 : i64, tpu.core_type = #tpu.core_type<tc>, window_params = [{transform_indices = @transform_0, window_bounds = array<i64: 16, 784>}, {pipeline_mode = #tpu.pipeline_mode<synchronous>, transform_indices = @transform_1, window_bounds = array<i64: 784, 128>}, {pipeline_mode = #tpu.pipeline_mode<synchronous>, transform_indices = @transform_2, window_bounds = array<i64: 1, 128>}, {pipeline_mode = #tpu.pipeline_mode<synchronous>, transform_indices = @transform_3, window_bounds = array<i64: 128, 128>}, {pipeline_mode = #tpu.pipeline_mode<synchronous>, transform_indices = @transform_4, window_bounds = array<i64: 1, 128>}, {pipeline_mode = #tpu.pipeline_mode<synchronous>, transform_indices = @transform_5, window_bounds = array<i64: 128, 128>}, {pipeline_mode = #tpu.pipeline_mode<synchronous>, transform_indices = @transform_6, window_bounds = array<i64: 1, 128>}, {pipeline_mode = #tpu.pipeline_mode<synchronous>, transform_indices = @transform_7, window_bounds = array<i64: 128, 128>}, {pipeline_mode = #tpu.pipeline_mode<synchronous>, transform_indices = @transform_8, window_bounds = array<i64: 1, 128>}, {pipeline_mode = #tpu.pipeline_mode<synchronous>, transform_indices = @transform_9, window_bounds = array<i64: 128, 128>}, {pipeline_mode = #tpu.pipeline_mode<synchronous>, transform_indices = @transform_10, window_bounds = array<i64: 1, 128>}, {pipeline_mode = #tpu.pipeline_mode<synchronous>, transform_indices = @transform_11, window_bounds = array<i64: 128, 128>}, {pipeline_mode = #tpu.pipeline_mode<synchronous>, transform_indices = @transform_12, window_bounds = array<i64: 1, 128>}, {transform_indices = @transform_13, window_bounds = array<i64: 16, 128>}]} {
    %c0 = arith.constant 0 : index
    %c0_0 = arith.constant 0 : index
    %0 = vector.load %arg1[%c0, %c0_0] : memref<16x784xbf16, #tpu.memory_space<vmem>>, vector<16x784xbf16>
    %c0_1 = arith.constant 0 : index
    %c0_2 = arith.constant 0 : index
    %1 = vector.load %arg2[%c0_1, %c0_2] : memref<784x128xbf16, #tpu.memory_space<vmem>>, vector<784x128xbf16>
    %cst = arith.constant dense<0.000000e+00> : vector<16x128xf32>
    %2 = tpu.matmul %0, %1, %cst {dimension_numbers = #tpu.dot_dimension_numbers<[1], [0], [0], [1], [0, 0, 1, 1], [], []>} : vector<16x784xbf16>, vector<784x128xbf16>, vector<16x128xf32> -> vector<16x128xf32>
    %c0_3 = arith.constant 0 : index
    %c0_4 = arith.constant 0 : index
    %3 = vector.load %arg3[%c0_3, %c0_4] : memref<1x128xf32, #tpu.memory_space<vmem>>, vector<1x128xf32>
    %4 = vector.broadcast %3 : vector<1x128xf32> to vector<16x128xf32>
    %5 = arith.addf %2, %4 : vector<16x128xf32>
    %cst_5 = arith.constant 5.000000e-01 : f32
    %6 = vector.broadcast %cst_5 : f32 to vector<16x128xf32>
    %7 = arith.mulf %6, %5 : vector<16x128xf32>
    %8 = math.tanh %7 : vector<16x128xf32>
    %cst_6 = arith.constant 1.000000e+00 : f32
    %9 = vector.broadcast %cst_6 : f32 to vector<16x128xf32>
    %10 = arith.addf %8, %9 : vector<16x128xf32>
    %cst_7 = arith.constant 5.000000e-01 : f32
    %11 = vector.broadcast %cst_7 : f32 to vector<16x128xf32>
    %12 = arith.mulf %11, %10 : vector<16x128xf32>
    %13 = arith.truncf %12 : vector<16x128xf32> to vector<16x128xbf16>
    %c0_8 = arith.constant 0 : index
    %c0_9 = arith.constant 0 : index
    %14 = vector.load %arg4[%c0_8, %c0_9] : memref<128x128xbf16, #tpu.memory_space<vmem>>, vector<128x128xbf16>
    %cst_10 = arith.constant dense<0.000000e+00> : vector<16x128xf32>
    %15 = tpu.matmul %13, %14, %cst_10 {dimension_numbers = #tpu.dot_dimension_numbers<[1], [0], [0], [1], [0, 0, 1, 1], [], []>} : vector<16x128xbf16>, vector<128x128xbf16>, vector<16x128xf32> -> vector<16x128xf32>
    %c0_11 = arith.constant 0 : index
    %c0_12 = arith.constant 0 : index
    %16 = vector.load %arg5[%c0_11, %c0_12] : memref<1x128xf32, #tpu.memory_space<vmem>>, vector<1x128xf32>
    %17 = vector.broadcast %16 : vector<1x128xf32> to vector<16x128xf32>
    %18 = arith.addf %15, %17 : vector<16x128xf32>
    %cst_13 = arith.constant 5.000000e-01 : f32
    %19 = vector.broadcast %cst_13 : f32 to vector<16x128xf32>
    %20 = arith.mulf %19, %18 : vector<16x128xf32>
    %21 = math.tanh %20 : vector<16x128xf32>
    %cst_14 = arith.constant 1.000000e+00 : f32
    %22 = vector.broadcast %cst_14 : f32 to vector<16x128xf32>
    %23 = arith.addf %21, %22 : vector<16x128xf32>
    %cst_15 = arith.constant 5.000000e-01 : f32
    %24 = vector.broadcast %cst_15 : f32 to vector<16x128xf32>
    %25 = arith.mulf %24, %23 : vector<16x128xf32>
    %26 = arith.truncf %25 : vector<16x128xf32> to vector<16x128xbf16>
    %c0_16 = arith.constant 0 : index
    %c0_17 = arith.constant 0 : index
    %27 = vector.load %arg6[%c0_16, %c0_17] : memref<128x128xbf16, #tpu.memory_space<vmem>>, vector<128x128xbf16>
    %cst_18 = arith.constant dense<0.000000e+00> : vector<16x128xf32>
    %28 = tpu.matmul %26, %27, %cst_18 {dimension_numbers = #tpu.dot_dimension_numbers<[1], [0], [0], [1], [0, 0, 1, 1], [], []>} : vector<16x128xbf16>, vector<128x128xbf16>, vector<16x128xf32> -> vector<16x128xf32>
    %c0_19 = arith.constant 0 : index
    %c0_20 = arith.constant 0 : index
    %29 = vector.load %arg7[%c0_19, %c0_20] : memref<1x128xf32, #tpu.memory_space<vmem>>, vector<1x128xf32>
    %30 = vector.broadcast %29 : vector<1x128xf32> to vector<16x128xf32>
    %31 = arith.addf %28, %30 : vector<16x128xf32>
    %cst_21 = arith.constant 5.000000e-01 : f32
    %32 = vector.broadcast %cst_21 : f32 to vector<16x128xf32>
    %33 = arith.mulf %32, %31 : vector<16x128xf32>
    %34 = math.tanh %33 : vector<16x128xf32>
    %cst_22 = arith.constant 1.000000e+00 : f32
    %35 = vector.broadcast %cst_22 : f32 to vector<16x128xf32>
    %36 = arith.addf %34, %35 : vector<16x128xf32>
    %cst_23 = arith.constant 5.000000e-01 : f32
    %37 = vector.broadcast %cst_23 : f32 to vector<16x128xf32>
    %38 = arith.mulf %37, %36 : vector<16x128xf32>
    %39 = arith.truncf %38 : vector<16x128xf32> to vector<16x128xbf16>
    %c0_24 = arith.constant 0 : index
    %c0_25 = arith.constant 0 : index
    %40 = vector.load %arg8[%c0_24, %c0_25] : memref<128x128xbf16, #tpu.memory_space<vmem>>, vector<128x128xbf16>
    %cst_26 = arith.constant dense<0.000000e+00> : vector<16x128xf32>
    %41 = tpu.matmul %39, %40, %cst_26 {dimension_numbers = #tpu.dot_dimension_numbers<[1], [0], [0], [1], [0, 0, 1, 1], [], []>} : vector<16x128xbf16>, vector<128x128xbf16>, vector<16x128xf32> -> vector<16x128xf32>
    %c0_27 = arith.constant 0 : index
    %c0_28 = arith.constant 0 : index
    %42 = vector.load %arg9[%c0_27, %c0_28] : memref<1x128xf32, #tpu.memory_space<vmem>>, vector<1x128xf32>
    %43 = vector.broadcast %42 : vector<1x128xf32> to vector<16x128xf32>
    %44 = arith.addf %41, %43 : vector<16x128xf32>
    %cst_29 = arith.constant 5.000000e-01 : f32
    %45 = vector.broadcast %cst_29 : f32 to vector<16x128xf32>
    %46 = arith.mulf %45, %44 : vector<16x128xf32>
    %47 = math.tanh %46 : vector<16x128xf32>
    %cst_30 = arith.constant 1.000000e+00 : f32
    %48 = vector.broadcast %cst_30 : f32 to vector<16x128xf32>
    %49 = arith.addf %47, %48 : vector<16x128xf32>
    %cst_31 = arith.constant 5.000000e-01 : f32
    %50 = vector.broadcast %cst_31 : f32 to vector<16x128xf32>
    %51 = arith.mulf %50, %49 : vector<16x128xf32>
    %52 = arith.truncf %51 : vector<16x128xf32> to vector<16x128xbf16>
    %c0_32 = arith.constant 0 : index
    %c0_33 = arith.constant 0 : index
    %53 = vector.load %arg10[%c0_32, %c0_33] : memref<128x128xbf16, #tpu.memory_space<vmem>>, vector<128x128xbf16>
    %cst_34 = arith.constant dense<0.000000e+00> : vector<16x128xf32>
    %54 = tpu.matmul %52, %53, %cst_34 {dimension_numbers = #tpu.dot_dimension_numbers<[1], [0], [0], [1], [0, 0, 1, 1], [], []>} : vector<16x128xbf16>, vector<128x128xbf16>, vector<16x128xf32> -> vector<16x128xf32>
    %c0_35 = arith.constant 0 : index
    %c0_36 = arith.constant 0 : index
    %55 = vector.load %arg11[%c0_35, %c0_36] : memref<1x128xf32, #tpu.memory_space<vmem>>, vector<1x128xf32>
    %56 = vector.broadcast %55 : vector<1x128xf32> to vector<16x128xf32>
    %57 = arith.addf %54, %56 : vector<16x128xf32>
    %cst_37 = arith.constant 5.000000e-01 : f32
    %58 = vector.broadcast %cst_37 : f32 to vector<16x128xf32>
    %59 = arith.mulf %58, %57 : vector<16x128xf32>
    %60 = math.tanh %59 : vector<16x128xf32>
    %cst_38 = arith.constant 1.000000e+00 : f32
    %61 = vector.broadcast %cst_38 : f32 to vector<16x128xf32>
    %62 = arith.addf %60, %61 : vector<16x128xf32>
    %cst_39 = arith.constant 5.000000e-01 : f32
    %63 = vector.broadcast %cst_39 : f32 to vector<16x128xf32>
    %64 = arith.mulf %63, %62 : vector<16x128xf32>
    %65 = arith.truncf %64 : vector<16x128xf32> to vector<16x128xbf16>
    %c0_40 = arith.constant 0 : index
    %c0_41 = arith.constant 0 : index
    %66 = vector.load %arg12[%c0_40, %c0_41] : memref<128x128xbf16, #tpu.memory_space<vmem>>, vector<128x128xbf16>
    %cst_42 = arith.constant dense<0.000000e+00> : vector<16x128xf32>
    %67 = tpu.matmul %65, %66, %cst_42 {dimension_numbers = #tpu.dot_dimension_numbers<[1], [0], [0], [1], [0, 0, 1, 1], [], []>} : vector<16x128xbf16>, vector<128x128xbf16>, vector<16x128xf32> -> vector<16x128xf32>
    %c0_43 = arith.constant 0 : index
    %c0_44 = arith.constant 0 : index
    %68 = vector.load %arg13[%c0_43, %c0_44] : memref<1x128xf32, #tpu.memory_space<vmem>>, vector<1x128xf32>
    %69 = vector.broadcast %68 : vector<1x128xf32> to vector<16x128xf32>
    %70 = arith.addf %67, %69 : vector<16x128xf32>
    %cst_45 = arith.constant 5.000000e-01 : f32
    %71 = vector.broadcast %cst_45 : f32 to vector<16x128xf32>
    %72 = arith.mulf %71, %70 : vector<16x128xf32>
    %73 = math.tanh %72 : vector<16x128xf32>
    %cst_46 = arith.constant 1.000000e+00 : f32
    %74 = vector.broadcast %cst_46 : f32 to vector<16x128xf32>
    %75 = arith.addf %73, %74 : vector<16x128xf32>
    %cst_47 = arith.constant 5.000000e-01 : f32
    %76 = vector.broadcast %cst_47 : f32 to vector<16x128xf32>
    %77 = arith.mulf %76, %75 : vector<16x128xf32>
    %78 = tpu.iota {dimensions = array<i32: 1>} : vector<16x128xi32>
    %c10_i32 = arith.constant 10 : i32
    %79 = vector.broadcast %c10_i32 : i32 to vector<16x128xi32>
    %80 = arith.cmpi slt, %78, %79 : vector<16x128xi32>
    %cst_48 = arith.constant -1.000000e+30 : f32
    %81 = vector.broadcast %cst_48 : f32 to vector<16x128xf32>
    %82 = arith.select %80, %77, %81 : vector<16x128xi1>, vector<16x128xf32>
    %cst_49 = arith.constant dense<0xFF800000> : vector<16xf32>
    %83 = vector.multi_reduction <maximumf>, %82, %cst_49 [1] : vector<16x128xf32> to vector<16xf32>
    %84 = vector.shape_cast %83 : vector<16xf32> to vector<16x1xf32>
    %85 = vector.broadcast %84 : vector<16x1xf32> to vector<16x128xf32>
    %86 = arith.subf %82, %85 : vector<16x128xf32>
    %87 = math.exp %86 : vector<16x128xf32>
    %cst_50 = arith.constant dense<0.000000e+00> : vector<16xf32>
    %88 = vector.multi_reduction <add>, %87, %cst_50 [1] : vector<16x128xf32> to vector<16xf32>
    %89 = vector.shape_cast %88 : vector<16xf32> to vector<16x1xf32>
    %90 = math.log %89 : vector<16x1xf32>
    %91 = vector.broadcast %90 : vector<16x1xf32> to vector<16x128xf32>
    %92 = arith.subf %86, %91 : vector<16x128xf32>
    %c0_51 = arith.constant 0 : index
    %c0_52 = arith.constant 0 : index
    %93 = vector.load %arg14[%c0_51, %c0_52] : memref<16x128xf32, #tpu.memory_space<vmem>>, vector<16x128xf32>
    tpu.vector_store %arg14[%c0_51, %c0_52], %92 {strides = array<i32>} : memref<16x128xf32, #tpu.memory_space<vmem>>, vector<16x128xf32>,
    return
  }
  func.func @transform_0(%arg0: i32) -> (i32, i32) {
    %c0_i32 = arith.constant 0 : i32
    %c0_i32_0 = arith.constant 0 : i32
    return %arg0, %c0_i32 : i32, i32
  }
  func.func @transform_1(%arg0: i32) -> (i32, i32) {
    %c0_i32 = arith.constant 0 : i32
    %c0_i32_0 = arith.constant 0 : i32
    %c0_i32_1 = arith.constant 0 : i32
    return %c0_i32, %c0_i32_0 : i32, i32
  }
  func.func @transform_2(%arg0: i32) -> (i32, i32) {
    %c0_i32 = arith.constant 0 : i32
    %c0_i32_0 = arith.constant 0 : i32
    %c0_i32_1 = arith.constant 0 : i32
    return %c0_i32, %c0_i32_0 : i32, i32
  }
  func.func @transform_3(%arg0: i32) -> (i32, i32) {
    %c0_i32 = arith.constant 0 : i32
    %c0_i32_0 = arith.constant 0 : i32
    %c0_i32_1 = arith.constant 0 : i32
    return %c0_i32, %c0_i32_0 : i32, i32
  }
  func.func @transform_4(%arg0: i32) -> (i32, i32) {
    %c0_i32 = arith.constant 0 : i32
    %c0_i32_0 = arith.constant 0 : i32
    %c0_i32_1 = arith.constant 0 : i32
    return %c0_i32, %c0_i32_0 : i32, i32
  }
  func.func @transform_5(%arg0: i32) -> (i32, i32) {
    %c0_i32 = arith.constant 0 : i32
    %c0_i32_0 = arith.constant 0 : i32
    %c0_i32_1 = arith.constant 0 : i32
    return %c0_i32, %c0_i32_0 : i32, i32
  }
  func.func @transform_6(%arg0: i32) -> (i32, i32) {
    %c0_i32 = arith.constant 0 : i32
    %c0_i32_0 = arith.constant 0 : i32
    %c0_i32_1 = arith.constant 0 : i32
    return %c0_i32, %c0_i32_0 : i32, i32
  }
  func.func @transform_7(%arg0: i32) -> (i32, i32) {
    %c0_i32 = arith.constant 0 : i32
    %c0_i32_0 = arith.constant 0 : i32
    %c0_i32_1 = arith.constant 0 : i32
    return %c0_i32, %c0_i32_0 : i32, i32
  }
  func.func @transform_8(%arg0: i32) -> (i32, i32) {
    %c0_i32 = arith.constant 0 : i32
    %c0_i32_0 = arith.constant 0 : i32
    %c0_i32_1 = arith.constant 0 : i32
    return %c0_i32, %c0_i32_0 : i32, i32
  }
  func.func @transform_9(%arg0: i32) -> (i32, i32) {
    %c0_i32 = arith.constant 0 : i32
    %c0_i32_0 = arith.constant 0 : i32
    %c0_i32_1 = arith.constant 0 : i32
    return %c0_i32, %c0_i32_0 : i32, i32
  }
  func.func @transform_10(%arg0: i32) -> (i32, i32) {
    %c0_i32 = arith.constant 0 : i32
    %c0_i32_0 = arith.constant 0 : i32
    %c0_i32_1 = arith.constant 0 : i32
    return %c0_i32, %c0_i32_0 : i32, i32
  }
  func.func @transform_11(%arg0: i32) -> (i32, i32) {
    %c0_i32 = arith.constant 0 : i32
    %c0_i32_0 = arith.constant 0 : i32
    %c0_i32_1 = arith.constant 0 : i32
    return %c0_i32, %c0_i32_0 : i32, i32
  }
  func.func @transform_12(%arg0: i32) -> (i32, i32) {
    %c0_i32 = arith.constant 0 : i32
    %c0_i32_0 = arith.constant 0 : i32
    %c0_i32_1 = arith.constant 0 : i32
    return %c0_i32, %c0_i32_0 : i32, i32
  }
  func.func @transform_13(%arg0: i32) -> (i32, i32) {
    %c0_i32 = arith.constant 0 : i32
    %c0_i32_0 = arith.constant 0 : i32
    return %arg0, %c0_i32 : i32, i32
  }
}

</mosaic_0001>

<bundles_post_ra>
// kernel: tpu_custom_call.1
= control target key start
LH: loop header
LB: loop body
LE: loop exit
PB: predicated region body
PF: predicated region fallthrough
CT: control target
= control target key end

     0   :  { %18 = vsyncpa [#allocation3], 0  ;;  %s2344_s0 = inlined_call_operand.hbm [shape: bf16[16,784], index: 0, kind: input, shape index: {}]   ;;  %s2345_s1 = inlined_call_operand.hbm [shape: bf16[784,128], index: 1, kind: input, shape index: {}]   ;;  %s2346_s2 = inlined_call_operand.vmem [shape: f32[1,128], index: 2, kind: input, shape index: {}]   ;;  %s2347_s3 = inlined_call_operand.hbm [shape: bf16[128,128], index: 3, kind: input, shape index: {}]   ;;  %s2348_s4 = inlined_call_operand.vmem [shape: f32[1,128], index: 4, kind: input, shape index: {}]   ;;  %s2349_s5 = inlined_call_operand.hbm [shape: bf16[128,128], index: 5, kind: input, shape index: {}]   ;;  %s2350_s6 = inlined_call_operand.vmem [shape: f32[1,128], index: 6, kind: input, shape index: {}]   ;;  %s2351_s7 = inlined_call_operand.hbm [shape: bf16[128,128], index: 7, kind: input, shape index: {}]   ;;  %s2352_s8 = inlined_call_operand.vmem [shape: f32[1,128], index: 8, kind: input, shape index: {}]   ;;  %s2353_s9 = inlined_call_operand.hbm [shape: bf16[128,128], index: 9, kind: input, shape index: {}]   ;;  %s2354_s10 = inlined_call_operand.vmem [shape: f32[1,128], index: 10, kind: input, shape index: {}]   ;;  %s2355_s11 = inlined_call_operand.hbm [shape: bf16[128,128], index: 11, kind: input, shape index: {}]   ;;  %s2356_s12 = inlined_call_operand.vmem [shape: f32[1,128], index: 12, kind: input, shape index: {}]   ;;  %s2357_s13 = inlined_call_operand.hbm [shape: f32[16,128], index: 13, kind: output, shape index: {}]  }
   0x1   :  { %19 = vsyncpa [#allocation6], 0 }
   0x2   :  { %20 = vsyncpa [#allocation9], 0 }
   0x3   :  { %21 = vsyncpa [#allocation12], 0 }
   0x4   :  { %22 = vsyncpa [#allocation4], 0  ;;  %s2066_s25 = smov [#allocation5]   ;;  %s1880_s29 = scalar_lea.hbm %s2345_s1, 6272 }
   0x5   :  { %s40_s26 = sshll.u32 %s2066_s25, 4  ;;  %p1881_p0 = scmp.ne.s32.totalorder %s2345_s1, %s1880_s29  ;;  %s41_s26 = int_to_ptr.vmem [resolvable:$true] %s40_s26 }
   0x6   :  { %p1884_p1 = scmp.lt.u32.totalorder %s1880_s29, %s2345_s1 }
   0x8   :  { %p1886_p2 = pnand %p1884_p1, %p1881_p0 }
   0xa   :  { %1889 = shalt.err (!%p1886_p2)
}
   0xb   :  { %s1890_s17 = scalar_lea.vmem %s41_s26, 6272  ;;  %p1895_p4 = scmp.lt.s32.totalorder %s41_s26, %s41_s26 }
   0xc   :  { %p1891_p3 = scmp.ne.s32.totalorder %s41_s26, %s1890_s17  ;;  %p1896_p5 = scmp.lt.s32.totalorder %s1890_s17, %s1890_s17 }
   0xe   :  { %p1897_p6 = por %p1896_p5, %p1895_p4 }
  0x10   :  { %p1898_p7 = pnand %p1897_p6, %p1891_p3 }
  0x12   :  { %1901 = shalt.err (!%p1898_p7)
}
  0x13   :  { %s2067_s18 = smov 64   ;;  %s2068_s19 = smov 4  }
  0x14   :  { %46 = dma.hbm_to_vmem [thread:$0]  %s2345_s1, 6272, %s41_s26, [#allocation6], %s2067_s18, %s2067_s18, %s2068_s19  }
  0x15   :  { %s2069_s22 = smov [#allocation8]   ;;  %s2070_s24 = smov [#allocation11]  }
  0x16   :  { %s68_s23 = sshll.u32 %s2069_s22, 4  ;;  %s96_s25 = sshll.u32 %s2070_s24, 4  ;;  %s69_s23 = int_to_ptr.vmem [resolvable:$true] %s68_s23  ;;  %s97_s25 = int_to_ptr.vmem [resolvable:$true] %s96_s25 }
  0x17   :  { %s1902_s29 = scalar_lea.hbm %s2349_s5, 1024 }
  0x18   :  { %p1903_p8 = scmp.ne.s32.totalorder %s2349_s5, %s1902_s29  ;;  %p1906_p9 = scmp.lt.u32.totalorder %s1902_s29, %s2349_s5 }
  0x1a   :  { %p1908_p10 = pnand %p1906_p9, %p1903_p8 }
  0x1c   :  { %1911 = shalt.err (!%p1908_p10)
}
  0x1d   :  { %s1912_s1 = scalar_lea.vmem %s69_s23, 1024  ;;  %p1917_p12 = scmp.lt.s32.totalorder %s69_s23, %s69_s23 }
  0x1e   :  { %p1913_p11 = scmp.ne.s32.totalorder %s69_s23, %s1912_s1  ;;  %p1918_p13 = scmp.lt.s32.totalorder %s1912_s1, %s1912_s1 }
  0x20   :  { %p1919_p0 = por %p1918_p13, %p1917_p12 }
  0x22   :  { %p1920_p1 = pnand %p1919_p0, %p1913_p11 }
  0x24   :  { %1923 = shalt.err (!%p1920_p1)
}
  0x25   :  { %74 = dma.hbm_to_vmem [thread:$0]  %s2349_s5, 1024, %s69_s23, [#allocation9], %s2067_s18, %s2067_s18, %s2068_s19  }
  0x26   :  { %s1924_s22 = scalar_lea.hbm %s2353_s9, 1024 }
  0x27   :  { %p1925_p2 = scmp.ne.s32.totalorder %s2353_s9, %s1924_s22  ;;  %p1928_p3 = scmp.lt.u32.totalorder %s1924_s22, %s2353_s9 }
  0x29   :  { %p1930_p4 = pnand %p1928_p3, %p1925_p2 }
  0x2b   :  { %1933 = shalt.err (!%p1930_p4)
}
  0x2c   :  { %s1934_s30 = scalar_lea.vmem %s97_s25, 1024  ;;  %p1939_p6 = scmp.lt.s32.totalorder %s97_s25, %s97_s25 }
  0x2d   :  { %p1935_p5 = scmp.ne.s32.totalorder %s97_s25, %s1934_s30  ;;  %p1940_p7 = scmp.lt.s32.totalorder %s1934_s30, %s1934_s30 }
  0x2f   :  { %p1941_p8 = por %p1940_p7, %p1939_p6 }
  0x31   :  { %p1942_p9 = pnand %p1941_p8, %p1935_p5 }
  0x33   :  { %1945 = shalt.err (!%p1942_p9)
}
  0x34   :  { %102 = dma.hbm_to_vmem [thread:$0]  %s2353_s9, 1024, %s97_s25, [#allocation12], %s2067_s18, %s2067_s18, %s2068_s19  }
  0x35   :  { %s2071_s14 = smov [#allocation2]   ;;  %s1946_s26 = scalar_lea.hbm %s2344_s0, 896 }
  0x36   :  { %s28_s15 = sshll.u32 %s2071_s14, 4  ;;  %p1947_p10 = scmp.ne.s32.totalorder %s2344_s0, %s1946_s26  ;;  %s29_s15 = int_to_ptr.vmem [resolvable:$true] %s28_s15 }
  0x37   :  { %p1950_p11 = scmp.lt.u32.totalorder %s1946_s26, %s2344_s0 }
  0x39   :  { %p1952_p12 = pnand %p1950_p11, %p1947_p10 }
  0x3b   :  { %1955 = shalt.err (!%p1952_p12)
}
  0x3c   :  { %s1956_s24 = scalar_lea.vmem %s29_s15, 896  ;;  %p1961_p0 = scmp.lt.s32.totalorder %s29_s15, %s29_s15 }
  0x3d   :  { %p1957_p13 = scmp.ne.s32.totalorder %s29_s15, %s1956_s24  ;;  %p1962_p1 = scmp.lt.s32.totalorder %s1956_s24, %s1956_s24 }
  0x3f   :  { %p1963_p2 = por %p1962_p1, %p1961_p0 }
  0x41   :  { %p1964_p3 = pnand %p1963_p2, %p1957_p13 }
  0x43   :  { %1967 = shalt.err (!%p1964_p3)
}
  0x44   :  { %s2072_s9 = smov 448   ;;  %s2073_s25 = smov 28  }
  0x45   :  { %34 = dma.hbm_to_vmem [thread:$0]  %s2344_s0, 896, %s29_s15, [#allocation3], %s2072_s9, %s2072_s9, %s2073_s25  }
  0x46   :  { %s2074_s29 = smov [#allocation7]   ;;  %s2075_s5 = smov [#allocation10]  }
  0x47   :  { %s54_s30 = sshll.u32 %s2074_s29, 4  ;;  %s82_s23 = sshll.u32 %s2075_s5, 4  ;;  %s55_s30 = int_to_ptr.vmem [resolvable:$true] %s54_s30  ;;  %s2209_s23 = int_to_ptr.vmem [resolvable:$true] %s82_s23 }
  0x48   :  { %s1968_s1 = scalar_lea.hbm %s2347_s3, 1024 }
  0x49   :  { %p1969_p4 = scmp.ne.s32.totalorder %s2347_s3, %s1968_s1  ;;  %p1972_p5 = scmp.lt.u32.totalorder %s1968_s1, %s2347_s3 }
  0x4b   :  { %p1974_p6 = pnand %p1972_p5, %p1969_p4 }
  0x4d   :  { %1977 = shalt.err (!%p1974_p6)
}
  0x4e   :  { %s1978_s0 = scalar_lea.vmem %s55_s30, 1024  ;;  %p1983_p8 = scmp.lt.s32.totalorder %s55_s30, %s55_s30 }
  0x4f   :  { %p1979_p7 = scmp.ne.s32.totalorder %s55_s30, %s1978_s0  ;;  %p1984_p9 = scmp.lt.s32.totalorder %s1978_s0, %s1978_s0 }
  0x51   :  { %p1985_p10 = por %p1984_p9, %p1983_p8 }
  0x53   :  { %p1986_p11 = pnand %p1985_p10, %p1979_p7 }
  0x55   :  { %1989 = shalt.err (!%p1986_p11)
}
  0x56   :  { %60 = dma.hbm_to_vmem [thread:$0]  %s2347_s3, 1024, %s55_s30, [#allocation6], %s2067_s18, %s2067_s18, %s2068_s19  }
  0x57   :  { %s1990_s25 = scalar_lea.hbm %s2351_s7, 1024 }
  0x58   :  { %p1991_p12 = scmp.ne.s32.totalorder %s2351_s7, %s1990_s25  ;;  %p1994_p13 = scmp.lt.u32.totalorder %s1990_s25, %s2351_s7 }
  0x5a   :  { %p1996_p0 = pnand %p1994_p13, %p1991_p12 }
  0x5c   :  { %1999 = shalt.err (!%p1996_p0)
}
  0x5d   :  { %s2000_s14 = scalar_lea.vmem %s2209_s23, 1024  ;;  %p2005_p2 = scmp.lt.s32.totalorder %s2209_s23, %s2209_s23 }
  0x5e   :  { %p2001_p1 = scmp.ne.s32.totalorder %s2209_s23, %s2000_s14  ;;  %p2006_p3 = scmp.lt.s32.totalorder %s2000_s14, %s2000_s14 }
  0x60   :  { %p2007_p4 = por %p2006_p3, %p2005_p2 }
  0x62   :  { %p2008_p5 = pnand %p2007_p4, %p2001_p1 }
  0x64   :  { %2011 = shalt.err (!%p2008_p5)
}
  0x65   :  { %88 = dma.hbm_to_vmem [thread:$0]  %s2351_s7, 1024, %s2209_s23, [#allocation9], %s2067_s18, %s2067_s18, %s2068_s19  }
  0x66   :  { %s2076_s16 = smov [#allocation13]   ;;  %s2012_s20 = scalar_lea.hbm %s2355_s11, 1024 }
  0x67   :  { %s110_s1 = sshll.u32 %s2076_s16, 4  ;;  %p2013_p6 = scmp.ne.s32.totalorder %s2355_s11, %s2012_s20  ;;  %s111_s1 = int_to_ptr.vmem [resolvable:$true] %s110_s1 }
  0x68   :  { %p2016_p7 = scmp.lt.u32.totalorder %s2012_s20, %s2355_s11 }
  0x6a   :  { %p2018_p8 = pnand %p2016_p7, %p2013_p6 }
  0x6c   :  { %2021 = shalt.err (!%p2018_p8)
}
  0x6d   :  { %s2022_s24 = scalar_lea.vmem %s111_s1, 1024  ;;  %p2027_p10 = scmp.lt.s32.totalorder %s111_s1, %s111_s1 }
  0x6e   :  { %p2023_p9 = scmp.ne.s32.totalorder %s111_s1, %s2022_s24  ;;  %p2028_p11 = scmp.lt.s32.totalorder %s2022_s24, %s2022_s24 }
  0x70   :  { %p2029_p12 = por %p2028_p11, %p2027_p10 }
  0x72   :  { %p2030_p13 = pnand %p2029_p12, %p2023_p9 }
  0x74   :  { %2033 = shalt.err (!%p2030_p13)
}
  0x75   :  { %116 = dma.hbm_to_vmem [thread:$0]  %s2355_s11, 1024, %s111_s1, [#allocation12], %s2067_s18, %s2067_s18, %s2068_s19  }
  0x76   :  { %2056 = dma.done.wait [#allocation3], 896  }
  0x77   :  { %2057 = vsyncadd [#allocation3], 4294966400 }
  0x78   :  { %2058 = dma.done.wait [#allocation6], 7296  }
  0x79   :  { %2059 = vsyncadd [#allocation6], 4294960000 }
  0x7a   :  { %2060 = dma.done.wait [#allocation9], 2048  }
  0x7b   :  { %2061 = vsyncadd [#allocation9], 4294965248 }
  0x7c   :  { %2062 = dma.done.wait [#allocation12], 2048  }
  0x7d   :  { %2063 = vsyncadd [#allocation12], 4294965248  ;;  %v1749_v0 = vld [vmem:[#allocation5 + $0x40] sm:$0xff]   ;;  %v1753_v4 = vld [vmem:[#allocation5 + $0x48] sm:$0xff]   ;;  %v2077_v38 = vmov 0.0   ;;  %vm2078_vm0 = vmmov 0  }
  0x7e   :  { %v1750_v1 = vld [vmem:[#allocation5] sm:$0xff]   ;;  %1514 = vmatprep.subr.bf16.mxu0 %v1749_v0  ;;  %v1754_v5 = vld [vmem:[#allocation5 + $0x8] sm:$0xff]   ;;  %v1757_v8 = vld [vmem:[#allocation5 + $0x50] sm:$0xff]   ;;  %vm583_vm1 = vcmask 130048  }
  0x7f   :  { %v1751_v2 = vld [vmem:[#allocation5 + $0xc0] sm:$0xff]   ;;  %1515 = vmatpush3.bf16.msra.mxu0 %v1750_v1  ;;  %v1755_v6 = vld [vmem:[#allocation5 + $0xc8] sm:$0xff]   ;;  %v1758_v9 = vld [vmem:[#allocation5 + $0x10] sm:$0xff]  }
  0x80   :  { %v1752_v3 = vld [vmem:[#allocation5 + $0x80] sm:$0xff]   ;;  %1536 = vmatprep.subr.bf16.mxu1 %v1751_v2  ;;  %1516 = vmatprep.subr.bf16.mxu0 %v1753_v4  ;;  %v1756_v7 = vld [vmem:[#allocation5 + $0x88] sm:$0xff]   ;;  %v1759_v10 = vld [vmem:[#allocation5 + $0xd0] sm:$0xff]  }
  0x81   :  { %1537 = vmatpush3.bf16.msra.mxu1 %v1752_v3  ;;  %v1760_v11 = vld [vmem:[#allocation5 + $0x90] sm:$0xff]   ;;  %v1761_v12 = vld [vmem:[#allocation5 + $0x58] sm:$0xff]   ;;  %v1765_v16 = vld [vmem:[#allocation5 + $0x60] sm:$0xff]  }
  0x82   :  { %1538 = vmatprep.subr.bf16.mxu1 %v1755_v6  ;;  %v1762_v13 = vld [vmem:[#allocation5 + $0x18] sm:$0xff]   ;;  %v1766_v17 = vld [vmem:[#allocation5 + $0x20] sm:$0xff]   ;;  %v1769_v20 = vld [vmem:[#allocation5 + $0x68] sm:$0xff]  }
  0x83   :  { %1517 = vmatpush3.bf16.msra.mxu0 %v1754_v5  ;;  %v1763_v14 = vld [vmem:[#allocation5 + $0xd8] sm:$0xff]   ;;  %v1767_v18 = vld [vmem:[#allocation5 + $0xe0] sm:$0xff]   ;;  %v1770_v21 = vld [vmem:[#allocation5 + $0x28] sm:$0xff]  }
  0x84   :  { %1518 = vmatprep.subr.bf16.mxu0 %v1757_v8  ;;  %v1764_v15 = vld [vmem:[#allocation5 + $0x98] sm:$0xff]   ;;  %v1768_v19 = vld [vmem:[#allocation5 + $0xa0] sm:$0xff]   ;;  %v1771_v22 = vld [vmem:[#allocation5 + $0xe8] sm:$0xff]  }
  0x85   :  { %1539 = vmatpush3.bf16.msra.mxu1 %v1756_v7  ;;  %v1772_v23 = vld [vmem:[#allocation5 + $0xa8] sm:$0xff]   ;;  %v1773_v24 = vld [vmem:[#allocation5 + $0x70] sm:$0xff]   ;;  %v1777_v28 = vld [vmem:[#allocation5 + $0x78] sm:$0xff]  }
  0x86   :  { %1540 = vmatprep.subr.bf16.mxu1 %v1759_v10  ;;  %v1774_v25 = vld [vmem:[#allocation5 + $0x30] sm:$0xff]   ;;  %v1778_v29 = vld [vmem:[#allocation5 + $0x38] sm:$0xff]   ;;  %v1780_v31 = vld [vmem:[#allocation2] ss:$28 sps:$4 sm:$0xff]  }
  0x87   :  { %1519 = vmatpush3.bf16.msra.mxu0 %v1758_v9  ;;  %v1775_v26 = vld [vmem:[#allocation5 + $0xf0] sm:$0xff]   ;;  %v1779_v30 = vld [vmem:[#allocation5 + $0xf8] sm:$0xff]   ;;  %v1782_v32 = vld [vmem:[#allocation2 + $0x4] ss:$28 sps:$4 sm:$0xff]  }
  0x88   :  { %1520 = vmatprep.subr.bf16.mxu0 %v1761_v12  ;;  %v1776_v27 = vld [vmem:[#allocation5 + $0xb0] sm:$0xff]   ;;  %v1783_v33 = vld [vmem:[#allocation5 + $0xb8] sm:$0xff]   ;;  %619 = vmatprep.mubr.bf16.mxu0 %v1782_v32  ;;  %v1784_v34 = vld [vmem:[#allocation5 + $0x140] sm:$0xff]  }
  0x89   :  { %1541 = vmatpush3.bf16.msra.mxu1 %v1760_v11  ;;  %v1785_v35 = vld [vmem:[#allocation2 + $0x8] ss:$28 sps:$4 sm:$0xff]   ;;  %v1788_v37 = vld [vmem:[#allocation5 + $0x100] sm:$0xff]   ;;  %v1793_v43 = vld [vmem:[#allocation5 + $0x158] sm:$0xff]  }
  0x8a   :  { %1542 = vmatprep.subr.bf16.mxu1 %v1763_v14  ;;  %v1787_v36 = vld [vmem:[#allocation2 + $0xc] ss:$28 sps:$4 sm:$0xff]   ;;  %v1789_v39 = vld [vmem:[#allocation5 + $0x148] sm:$0xff]   ;;  %v1794_v44 = vld [vmem:[#allocation5 + $0x118] sm:$0xff]  }
  0x8b   :  { %1521 = vmatpush3.bf16.msra.mxu0 %v1762_v13  ;;  %660 = vmatprep.mubr.bf16.mxu1 %v1787_v36  ;;  %v1790_v40 = vld [vmem:[#allocation5 + $0x108] sm:$0xff]   ;;  %v1791_v41 = vld [vmem:[#allocation5 + $0x150] sm:$0xff]   ;;  %v1795_v45 = vld [vmem:[#allocation5 + $0x160] sm:$0xff]  }
  0x8c   :  { %1522 = vmatprep.subr.bf16.mxu0 %v1765_v16  ;;  %v1792_v42 = vld [vmem:[#allocation5 + $0x110] sm:$0xff]   ;;  %v1796_v46 = vld [vmem:[#allocation5 + $0x120] sm:$0xff]   ;;  %v1797_v47 = vld [vmem:[#allocation5 + $0x168] sm:$0xff]  }
  0x8d   :  { %1543 = vmatpush3.bf16.msra.mxu1 %v1764_v15  ;;  %v1803_v48 = vld [vmem:[#allocation5 + $0x180] sm:$0xff]   ;;  %v1798_v49 = vld [vmem:[#allocation5 + $0x128] sm:$0xff]   ;;  %v1806_v50 = vld [vmem:[#allocation2 + $0x14] ss:$28 sps:$4 sm:$0xff]  }
  0x8e   :  { %1544 = vmatprep.subr.bf16.mxu1 %v1767_v18  ;;  %v1799_v51 = vld [vmem:[#allocation5 + $0x170] sm:$0xff]   ;;  %v1807_v52 = vld [vmem:[#allocation2 + $0x18] ss:$28 sps:$4 sm:$0xff]   ;;  %v1808_v57 = vld [vmem:[#allocation7] sm:$0xff]  }
  0x8f   :  { %1523 = vmatpush3.bf16.msra.mxu0 %v1766_v17  ;;  %v1800_v53 = vld [vmem:[#allocation5 + $0x130] sm:$0xff]   ;;  %v1801_v54 = vld [vmem:[#allocation5 + $0x178] sm:$0xff]   ;;  %v1811_v60 = vld [vmem:[#allocation7 + $0x18] sm:$0xff]  }
  0x90   :  { %1524 = vmatprep.subr.bf16.mxu0 %v1769_v20  ;;  %v1802_v55 = vld [vmem:[#allocation5 + $0x138] sm:$0xff]   ;;  %v1809_v58 = vld [vmem:[#allocation7 + $0x8] sm:$0xff]   ;;  %v1812_v61 = vld [vmem:[#allocation7 + $0x20] sm:$0xff]  }
  0x91   :  { %1545 = vmatpush3.bf16.msra.mxu1 %v1768_v19  ;;  %v1804_v56 = vld [vmem:[#allocation2 + $0x10] ss:$28 sps:$4 sm:$0xff]   ;;  %v1815_v0 = vld [vmem:[#allocation7 + $0x38] sm:$0xff]   ;;  %v1816_v1 = vld [vmem:[#allocation8] sm:$0xff]  }
  0x92   :  { %1546 = vmatprep.subr.bf16.mxu1 %v1771_v22  ;;  %v1810_v59 = vld [vmem:[#allocation7 + $0x10] sm:$0xff]   ;;  %v1813_v62 = vld [vmem:[#allocation7 + $0x28] sm:$0xff]   ;;  %v1411_v4 = vld [vmem:[%s2346_s2] ss:$0 sm:$0xff] }
  0x93   :  { %1525 = vmatpush3.bf16.msra.mxu0 %v1770_v21  ;;  %v1814_v63 = vld [vmem:[#allocation7 + $0x30] sm:$0xff]   ;;  %v1817_v2 = vld [vmem:[#allocation8 + $0x8] sm:$0xff]  }
  0x94   :  { %1526 = vmatprep.subr.bf16.mxu0 %v1773_v24 }
  0x95   :  { %1547 = vmatpush3.bf16.msra.mxu1 %v1772_v23 }
  0x96   :  { %1548 = vmatprep.subr.bf16.mxu1 %v1775_v26 }
  0x97   :  { %1527 = vmatpush3.bf16.msra.mxu0 %v1774_v25 }
  0x98   :  { %1528 = vmatprep.subr.bf16.mxu0 %v1777_v28 }
  0x99   :  { %1549 = vmatpush3.bf16.msra.mxu1 %v1776_v27 }
  0x9a   :  { %1550 = vmatprep.subr.bf16.mxu1 %v1779_v30 }
  0x9b   :  { %1529 = vmatpush3.bf16.msra.mxu0 %v1778_v29 }
  0x9c   :  { %1558 = vmatprep.subr.bf16.mxu0 %v1784_v34 }
  0x9d   :  { %1551 = vmatpush3.bf16.msra.mxu1 %v1783_v33 }
  0x9e   :  { %620 = vmatmul.mubr.bf16.vlgmr.msra.gmra.mrb[0].mxu0 %v1780_v31  ;;  %1627 = vmatprep.subr.bf16.mxu1 %v2077_v38 }
  0x9f   :  { %1559 = vmatpush3.bf16.msra.mxu0 %v1788_v37  ;;  %701 = vmatprep.mubr.bf16.mxu0 %v1806_v50  ;;  %v1824_v50 = vld [vmem:[#allocation10] sm:$0xff]  }
  0xa0   :  { %661 = vmatmul.mubr.bf16.vlgmr.msra.gmra.mrb[0].mxu1 %v1785_v35  ;;  %1560 = vmatprep.subr.bf16.mxu0 %v1789_v39 }
  0xa1   :  { %1629 = vmatprep.mubr.msk.bf16.mxu1 %vm2078_vm0, %v2077_v38  ;;  %1628 = vmatpush3.bf16.msra.mxu1 %v1803_v48  ;;  %v1822_v48 = vld [vmem:[#allocation8 + $0x30] sm:$0xff]  }
  0xa2   :  { %1633 = vmatprep.subr.bf16.mxu1 %v2077_v38 }
  0xa3   :  { %1561 = vmatpush3.bf16.msra.mxu0 %v1790_v40 }
  0xa4   :  { %1562 = vmatprep.subr.bf16.mxu0 %v1791_v41 }
  0xa7   :  { %1563 = vmatpush3.bf16.msra.mxu0 %v1792_v42 }
  0xa8   :  { %1564 = vmatprep.subr.bf16.mxu0 %v1793_v43  ;;  %1630 = vmatmul.mubr.msk.bf16.vlgmr.msra.gmra.mrb[4].mxu1 %vm583_vm1, %v1807_v52  ;;  %v1469_v52 = vld [vmem:[%s2348_s4] ss:$0 sm:$0xff] }
  0xa9   :  { %1649 = vmatprep.mubr.msk.bf16.mxu1 %vm2078_vm0, %v2077_v38  ;;  %1634 = vmatpush3.bf16.msra.mxu1 %v1808_v57 }
  0xaa   :  { %1635 = vmatprep.subr.bf16.mxu1 %v2077_v38 }
  0xab   :  { %1565 = vmatpush3.bf16.msra.mxu0 %v1794_v44  ;;  %v1818_v44 = vld [vmem:[#allocation8 + $0x10] sm:$0xff]  }
  0xac   :  { %1566 = vmatprep.subr.bf16.mxu0 %v1795_v45  ;;  %v1819_v45 = vld [vmem:[#allocation8 + $0x18] sm:$0xff]  }
  0xad   :  { %1636 = vmatpush3.bf16.msra.mxu1 %v1809_v58 }
  0xae   :  { %1637 = vmatprep.subr.bf16.mxu1 %v2077_v38 }
  0xaf   :  { %1567 = vmatpush3.bf16.msra.mxu0 %v1796_v46  ;;  %v1820_v46 = vld [vmem:[#allocation8 + $0x20] sm:$0xff]  }
  0xb0   :  { %1568 = vmatprep.subr.bf16.mxu0 %v1797_v47  ;;  %v1821_v47 = vld [vmem:[#allocation8 + $0x28] sm:$0xff]  }
  0xb1   :  { %1638 = vmatpush3.bf16.msra.mxu1 %v1810_v59 }
  0xb2   :  { %1639 = vmatprep.subr.bf16.mxu1 %v2077_v38 }
  0xb3   :  { %1569 = vmatpush3.bf16.msra.mxu0 %v1798_v49  ;;  %v1823_v49 = vld [vmem:[#allocation8 + $0x38] sm:$0xff]  }
  0xb4   :  { %1570 = vmatprep.subr.bf16.mxu0 %v1799_v51  ;;  %v1825_v51 = vld [vmem:[#allocation10 + $0x8] sm:$0xff]  }
  0xb5   :  { %1640 = vmatpush3.bf16.msra.mxu1 %v1811_v60 }
  0xb6   :  { %1641 = vmatprep.subr.bf16.mxu1 %v2077_v38 }
  0xb7   :  { %1571 = vmatpush3.bf16.msra.mxu0 %v1800_v53 }
  0xb8   :  { %1572 = vmatprep.subr.bf16.mxu0 %v1801_v54 }
  0xb9   :  { %1642 = vmatpush3.bf16.msra.mxu1 %v1812_v61 }
  0xba   :  { %1643 = vmatprep.subr.bf16.mxu1 %v2077_v38 }
  0xbb   :  { %1573 = vmatpush3.bf16.msra.mxu0 %v1802_v55 }
  0xbc   :  { %1653 = vmatprep.subr.bf16.mxu0 %v2077_v38 }
  0xbd   :  { %1644 = vmatpush3.bf16.msra.mxu1 %v1813_v62 }
  0xbe   :  { %702 = vmatmul.mubr.bf16.vlgmr.msra.gmra.mrb[4].mxu0 %v1804_v56  ;;  %1645 = vmatprep.subr.bf16.mxu1 %v2077_v38 }
  0xbf   :  { %1669 = vmatprep.mubr.msk.bf16.mxu0 %vm2078_vm0, %v2077_v38  ;;  %1654 = vmatpush3.bf16.msra.mxu0 %v1816_v1 }
  0xc0   :  { %1655 = vmatprep.subr.bf16.mxu0 %v2077_v38 }
  0xc1   :  { %1646 = vmatpush3.bf16.msra.mxu1 %v1814_v63 }
  0xc2   :  { %1647 = vmatprep.subr.bf16.mxu1 %v2077_v38 }
  0xc3   :  { %1656 = vmatpush3.bf16.msra.mxu0 %v1817_v2 }
  0xc4   :  { %1657 = vmatprep.subr.bf16.mxu0 %v2077_v38 }
  0xc5   :  { %1648 = vmatpush3.bf16.msra.mxu1 %v1815_v0 }
  0xc6   :  { %1673 = vmatprep.subr.bf16.mxu1 %v2077_v38 }
  0xc7   :  { %1658 = vmatpush3.bf16.msra.mxu0 %v1818_v44 }
  0xc8   :  { %1659 = vmatprep.subr.bf16.mxu0 %v2077_v38 }
  0xcb   :  { %1660 = vmatpush3.bf16.msra.mxu0 %v1819_v45 }
  0xcc   :  { %1661 = vmatprep.subr.bf16.mxu0 %v2077_v38 }
  0xcf   :  { %1662 = vmatpush3.bf16.msra.mxu0 %v1820_v46 }
  0xd0   :  { %1663 = vmatprep.subr.bf16.mxu0 %v2077_v38 }
  0xd3   :  { %1664 = vmatpush3.bf16.msra.mxu0 %v1821_v47 }
  0xd4   :  { %1665 = vmatprep.subr.bf16.mxu0 %v2077_v38 }
  0xd7   :  { %1666 = vmatpush3.bf16.msra.mxu0 %v1822_v48 }
  0xd8   :  { %1667 = vmatprep.subr.bf16.mxu0 %v2077_v38 }
  0xdb   :  { %1668 = vmatpush3.bf16.msra.mxu0 %v1823_v49 }
  0xdc   :  { %1693 = vmatprep.subr.bf16.mxu0 %v2077_v38 }
 0x171   :  { %v1530_v3 = vpop.f32.mrb[0].mxu0 }
 0x172   :  { %v1531_v5 = vpop.f32.mrb[1].mxu0 }
 0x173   :  { %v1532_v6 = vadd.f32 %v1531_v5, %v1530_v3  ;;  %v1533_v7 = vpop.f32.mrb[2].mxu0  ;;  %v1552_v8 = vpop.f32.mrb[0].mxu1  ;;  %v1827_v5 = vld [vmem:[#allocation10 + $0x18] sm:$0xff]  }
 0x174   :  { %v1534_v9 = vpop.f32.mrb[3].mxu0  ;;  %v1553_v12 = vpop.f32.mrb[1].mxu1 }
 0x175   :  { %v622_v10 = vadd.f32 %v1532_v6, %v1411_v4  ;;  %v1535_v11 = vadd.f32 %v1534_v9, %v1533_v7  ;;  %v1554_v13 = vadd.f32 %v1553_v12, %v1552_v8  ;;  %v1555_v14 = vpop.f32.mrb[2].mxu1  ;;  %v1828_v6 = vld [vmem:[#allocation10 + $0x20] sm:$0xff]   ;;  %v1829_v7 = vld [vmem:[#allocation10 + $0x28] sm:$0xff]   ;;  %v1830_v8 = vld [vmem:[#allocation10 + $0x30] sm:$0xff]  }
 0x176   :  { %v1556_v16 = vpop.f32.mrb[3].mxu1  ;;  %v1831_v9 = vld [vmem:[#allocation10 + $0x38] sm:$0xff]   ;;  %v1478_v12 = vld [vmem:[%s2350_s6] ss:$0 sm:$0xff] }
 0x177   :  { %v625_v15 = vadd.f32 %v1535_v11, %v1411_v4  ;;  %v663_v17 = vadd.f32 %v1554_v13, %v622_v10  ;;  %v1557_v18 = vadd.f32 %v1556_v16, %v1555_v14  ;;  %v1826_v4 = vld [vmem:[#allocation10 + $0x10] sm:$0xff]   ;;  %v1832_v10 = vld [vmem:[#allocation11] sm:$0xff]   ;;  %v1833_v11 = vld [vmem:[#allocation11 + $0x8] sm:$0xff]  }
 0x179   :  { %v666_v19 = vadd.f32 %v1557_v18, %v625_v15 }
 0x17b   :  { %v744_v20 = vpop.f32.mrb[4].mxu1 }
 0x17c   :  { %v1631_v21 = vpop.f32.mrb[5].mxu1 }
 0x17d   :  { %v747_v22 = vpop.f32.mrb[6].mxu1 }
 0x17e   :  { %v1632_v23 = vpop.f32.mrb[7].mxu1 }
 0x191   :  { %v1574_v24 = vpop.f32.mrb[4].mxu0 }
 0x192   :  { %v1575_v25 = vpop.f32.mrb[5].mxu0 }
 0x193   :  { %v1576_v26 = vadd.f32 %v1575_v25, %v1574_v24  ;;  %v1577_v27 = vpop.f32.mrb[6].mxu0 }
 0x194   :  { %v1578_v28 = vpop.f32.mrb[7].mxu0 }
 0x195   :  { %v704_v29 = vadd.f32 %v1576_v26, %v663_v17  ;;  %v1579_v30 = vadd.f32 %v1578_v28, %v1577_v27  ;;  %v1834_v28 = vld [vmem:[#allocation11 + $0x10] sm:$0xff]  }
 0x197   :  { %v745_v31 = vadd.f32 %v744_v20, %v704_v29  ;;  %v707_v32 = vadd.f32 %v1579_v30, %v666_v19  ;;  %v1835_v29 = vld [vmem:[#allocation11 + $0x18] sm:$0xff]   ;;  %v1836_v30 = vld [vmem:[#allocation11 + $0x20] sm:$0xff]  }
 0x199   :  { %v751_v33 = vmul.f32 0.5, %v745_v31  ;;  %v748_v34 = vadd.f32 %v747_v22, %v707_v32  ;;  %v1837_v31 = vld [vmem:[#allocation11 + $0x28] sm:$0xff]   ;;  %v1838_v32 = vld [vmem:[#allocation11 + $0x30] sm:$0xff]  }
 0x19b   :  { %1848 = vtanh.f32 %v751_v33  ;;  %v752_v35 = vmul.f32 0.5, %v748_v34  ;;  %v1839_v33 = vld [vmem:[#allocation11 + $0x38] sm:$0xff]   ;;  %v1840_v34 = vld [vmem:[#allocation13] sm:$0xff]  }
 0x19d   :  { %1850 = vtanh.f32 %v752_v35  ;;  %v1841_v35 = vld [vmem:[#allocation13 + $0x8] sm:$0xff]  }
 0x1a5   :  { %v1849_v36 = vpop.eup %1848 }
 0x1a6   :  { %v755_v37 = vadd.f32 1.0, %v1849_v36  ;;  %v1487_v36 = vld [vmem:[%s2352_s8] ss:$0 sm:$0xff] }
 0x1a7   :  { %v1851_v39 = vpop.eup %1850 }
 0x1a8   :  { %v756_v40 = vadd.f32 1.0, %v1851_v39  ;;  %v757_v41 = vmul.f32 0.5, %v755_v37 }
 0x1aa   :  { %v758_v42 = vmul.f32 0.5, %v756_v40 }
 0x1ac   :  { %v759_v43 = vpack.c.bf16 %v758_v42, %v757_v41 }
 0x1ae   :  { %1650 = vmatmul.mubr.bf16.vlgmr.msra.gmra.mrb[8].mxu1 %v759_v43 }
 0x1af   :  { %1689 = vmatprep.mubr.msk.bf16.mxu1 %vm2078_vm0, %v2077_v38  ;;  %1674 = vmatpush3.bf16.msra.mxu1 %v1824_v50 }
 0x1b0   :  { %1675 = vmatprep.subr.bf16.mxu1 %v2077_v38 }
 0x1b3   :  { %1676 = vmatpush3.bf16.msra.mxu1 %v1825_v51 }
 0x1b4   :  { %1677 = vmatprep.subr.bf16.mxu1 %v2077_v38 }
 0x1b7   :  { %1678 = vmatpush3.bf16.msra.mxu1 %v1826_v4 }
 0x1b8   :  { %1679 = vmatprep.subr.bf16.mxu1 %v2077_v38 }
 0x1bb   :  { %1680 = vmatpush3.bf16.msra.mxu1 %v1827_v5 }
 0x1bc   :  { %1681 = vmatprep.subr.bf16.mxu1 %v2077_v38 }
 0x1bf   :  { %1682 = vmatpush3.bf16.msra.mxu1 %v1828_v6 }
 0x1c0   :  { %1683 = vmatprep.subr.bf16.mxu1 %v2077_v38 }
 0x1c3   :  { %1684 = vmatpush3.bf16.msra.mxu1 %v1829_v7 }
 0x1c4   :  { %1685 = vmatprep.subr.bf16.mxu1 %v2077_v38 }
 0x1c7   :  { %1686 = vmatpush3.bf16.msra.mxu1 %v1830_v8 }
 0x1c8   :  { %1687 = vmatprep.subr.bf16.mxu1 %v2077_v38 }
 0x1cb   :  { %1688 = vmatpush3.bf16.msra.mxu1 %v1831_v9 }
 0x1cc   :  { %1713 = vmatprep.subr.bf16.mxu1 %v2077_v38 }
 0x281   :  { %v865_v53 = vpop.f32.mrb[8].mxu1 }
 0x282   :  { %v866_v54 = vadd.f32 %v1469_v52, %v865_v53  ;;  %v1651_v55 = vpop.f32.mrb[9].mxu1  ;;  %v1842_v53 = vld [vmem:[#allocation13 + $0x10] sm:$0xff]  }
 0x283   :  { %v868_v56 = vpop.f32.mrb[10].mxu1  ;;  %v1844_v55 = vld [vmem:[#allocation13 + $0x20] sm:$0xff]  }
 0x284   :  { %v872_v57 = vmul.f32 0.5, %v866_v54  ;;  %v869_v58 = vadd.f32 %v1469_v52, %v868_v56  ;;  %v1652_v59 = vpop.f32.mrb[11].mxu1  ;;  %v1843_v54 = vld [vmem:[#allocation13 + $0x18] sm:$0xff]   ;;  %v1845_v56 = vld [vmem:[#allocation13 + $0x28] sm:$0xff]  }
 0x285   :  { %v1496_v59 = vld [vmem:[%s2354_s10] ss:$0 sm:$0xff] }
 0x286   :  { %1852 = vtanh.f32 %v872_v57  ;;  %v873_v60 = vmul.f32 0.5, %v869_v58  ;;  %v1846_v57 = vld [vmem:[#allocation13 + $0x30] sm:$0xff]   ;;  %v1847_v58 = vld [vmem:[#allocation13 + $0x38] sm:$0xff]  }
 0x288   :  { %1854 = vtanh.f32 %v873_v60 }
 0x290   :  { %v1853_v61 = vpop.eup %1852 }
 0x291   :  { %v876_v62 = vadd.f32 1.0, %v1853_v61 }
 0x292   :  { %v1855_v63 = vpop.eup %1854 }
 0x293   :  { %v877_v0 = vadd.f32 1.0, %v1855_v63  ;;  %v878_v1 = vmul.f32 0.5, %v876_v62 }
 0x295   :  { %v879_v2 = vmul.f32 0.5, %v877_v0 }
 0x297   :  { %v880_v3 = vpack.c.bf16 %v879_v2, %v878_v1 }
 0x299   :  { %1670 = vmatmul.mubr.bf16.vlgmr.msra.gmra.mrb[8].mxu0 %v880_v3 }
 0x29a   :  { %1709 = vmatprep.mubr.msk.bf16.mxu0 %vm2078_vm0, %v2077_v38  ;;  %1694 = vmatpush3.bf16.msra.mxu0 %v1832_v10  ;;  %v1505_v10 = vld [vmem:[%s2356_s12] ss:$0 sm:$0xff]  ;;  %s2079_s12 = smov [#allocation14]  }
 0x29b   :  { %1695 = vmatprep.subr.bf16.mxu0 %v2077_v38  ;;  %s1396_s29 = sshll.u32 %s2079_s12, 4  ;;  %s1397_s29 = int_to_ptr.vmem [resolvable:$true] %s1396_s29 }
 0x29c   :  { %s2034_s5 = scalar_lea.vmem %s1397_s29, 256  ;;  %p2039_p1 = scmp.lt.s32.totalorder %s1397_s29, %s1397_s29 }
 0x29d   :  { %p2035_p0 = scmp.ne.s32.totalorder %s1397_s29, %s2034_s5  ;;  %p2040_p2 = scmp.lt.s32.totalorder %s2034_s5, %s2034_s5 }
 0x29e   :  { %1696 = vmatpush3.bf16.msra.mxu0 %v1833_v11 }
 0x29f   :  { %1697 = vmatprep.subr.bf16.mxu0 %v2077_v38  ;;  %p2041_p3 = por %p2040_p2, %p2039_p1 }
 0x2a1   :  { %p2042_p4 = pnand %p2041_p3, %p2035_p0 }
 0x2a2   :  { %1698 = vmatpush3.bf16.msra.mxu0 %v1834_v28 }
 0x2a3   :  { %1699 = vmatprep.subr.bf16.mxu0 %v2077_v38 }
 0x2a6   :  { %1700 = vmatpush3.bf16.msra.mxu0 %v1835_v29 }
 0x2a7   :  { %1701 = vmatprep.subr.bf16.mxu0 %v2077_v38 }
 0x2aa   :  { %1702 = vmatpush3.bf16.msra.mxu0 %v1836_v30 }
 0x2ab   :  { %1703 = vmatprep.subr.bf16.mxu0 %v2077_v38 }
 0x2ae   :  { %1704 = vmatpush3.bf16.msra.mxu0 %v1837_v31 }
 0x2af   :  { %1705 = vmatprep.subr.bf16.mxu0 %v2077_v38 }
 0x2b2   :  { %1706 = vmatpush3.bf16.msra.mxu0 %v1838_v32 }
 0x2b3   :  { %1707 = vmatprep.subr.bf16.mxu0 %v2077_v38 }
 0x2b6   :  { %1708 = vmatpush3.bf16.msra.mxu0 %v1839_v33 }
 0x36c   :  { %v986_v13 = vpop.f32.mrb[8].mxu0 }
 0x36d   :  { %v987_v14 = vadd.f32 %v1478_v12, %v986_v13  ;;  %v1671_v15 = vpop.f32.mrb[9].mxu0 }
 0x36e   :  { %v989_v16 = vpop.f32.mrb[10].mxu0 }
 0x36f   :  { %v993_v17 = vmul.f32 0.5, %v987_v14  ;;  %v990_v18 = vadd.f32 %v1478_v12, %v989_v16  ;;  %v1672_v19 = vpop.f32.mrb[11].mxu0 }
 0x370   :  { %v1364_v19 = vlaneseq }
 0x371   :  { %1856 = vtanh.f32 %v993_v17  ;;  %v994_v20 = vmul.f32 0.5, %v990_v18 }
 0x373   :  { %1858 = vtanh.f32 %v994_v20  ;;  %v1365_v20 = vand.u32 127, %v1364_v19 }
 0x375   :  { %vm1366_vm2 = vcmp.lt.s32.totalorder %v1365_v20, 10 }
 0x37b   :  { %v1857_v21 = vpop.eup %1856 }
 0x37c   :  { %v997_v22 = vadd.f32 1.0, %v1857_v21 }
 0x37d   :  { %v1859_v23 = vpop.eup %1858 }
 0x37e   :  { %v998_v24 = vadd.f32 1.0, %v1859_v23  ;;  %v999_v25 = vmul.f32 0.5, %v997_v22 }
 0x380   :  { %v1000_v26 = vmul.f32 0.5, %v998_v24 }
 0x382   :  { %v1001_v27 = vpack.c.bf16 %v1000_v26, %v999_v25 }
 0x384   :  { %1690 = vmatmul.mubr.bf16.vlgmr.msra.gmra.mrb[12].mxu1 %v1001_v27 }
 0x385   :  { %1729 = vmatprep.mubr.msk.bf16.mxu1 %vm2078_vm0, %v2077_v38  ;;  %1714 = vmatpush3.bf16.msra.mxu1 %v1840_v34 }
 0x386   :  { %1715 = vmatprep.subr.bf16.mxu1 %v2077_v38 }
 0x389   :  { %1716 = vmatpush3.bf16.msra.mxu1 %v1841_v35 }
 0x38a   :  { %1717 = vmatprep.subr.bf16.mxu1 %v2077_v38 }
 0x38d   :  { %1718 = vmatpush3.bf16.msra.mxu1 %v1842_v53 }
 0x38e   :  { %1719 = vmatprep.subr.bf16.mxu1 %v2077_v38 }
 0x391   :  { %1720 = vmatpush3.bf16.msra.mxu1 %v1843_v54 }
 0x392   :  { %1721 = vmatprep.subr.bf16.mxu1 %v2077_v38 }
 0x395   :  { %1722 = vmatpush3.bf16.msra.mxu1 %v1844_v55 }
 0x396   :  { %1723 = vmatprep.subr.bf16.mxu1 %v2077_v38 }
 0x399   :  { %1724 = vmatpush3.bf16.msra.mxu1 %v1845_v56 }
 0x39a   :  { %1725 = vmatprep.subr.bf16.mxu1 %v2077_v38 }
 0x39d   :  { %1726 = vmatpush3.bf16.msra.mxu1 %v1846_v57 }
 0x39e   :  { %1727 = vmatprep.subr.bf16.mxu1 %v2077_v38 }
 0x3a1   :  { %1728 = vmatpush3.bf16.msra.mxu1 %v1847_v58 }
 0x457   :  { %v1107_v37 = vpop.f32.mrb[12].mxu1 }
 0x458   :  { %v1108_v39 = vadd.f32 %v1487_v36, %v1107_v37  ;;  %v1691_v40 = vpop.f32.mrb[13].mxu1 }
 0x459   :  { %v1110_v41 = vpop.f32.mrb[14].mxu1 }
 0x45a   :  { %v1114_v42 = vmul.f32 0.5, %v1108_v39  ;;  %v1111_v43 = vadd.f32 %v1487_v36, %v1110_v41  ;;  %v1692_v44 = vpop.f32.mrb[15].mxu1 }
 0x45c   :  { %1860 = vtanh.f32 %v1114_v42  ;;  %v1115_v45 = vmul.f32 0.5, %v1111_v43 }
 0x45e   :  { %1862 = vtanh.f32 %v1115_v45 }
 0x466   :  { %v1861_v46 = vpop.eup %1860 }
 0x467   :  { %v1118_v47 = vadd.f32 1.0, %v1861_v46 }
 0x468   :  { %v1863_v48 = vpop.eup %1862 }
 0x469   :  { %v1119_v49 = vadd.f32 1.0, %v1863_v48  ;;  %v1120_v50 = vmul.f32 0.5, %v1118_v47 }
 0x46b   :  { %v1121_v51 = vmul.f32 0.5, %v1119_v49 }
 0x46d   :  { %v1122_v52 = vpack.c.bf16 %v1121_v51, %v1120_v50 }
 0x46f   :  { %1710 = vmatmul.mubr.bf16.vlgmr.msra.gmra.mrb[12].mxu0 %v1122_v52 }
 0x542   :  { %v1228_v60 = vpop.f32.mrb[12].mxu0 }
 0x543   :  { %v1229_v61 = vadd.f32 %v1496_v59, %v1228_v60  ;;  %v1711_v62 = vpop.f32.mrb[13].mxu0 }
 0x544   :  { %v1231_v63 = vpop.f32.mrb[14].mxu0 }
 0x545   :  { %v1235_v0 = vmul.f32 0.5, %v1229_v61  ;;  %v1232_v1 = vadd.f32 %v1496_v59, %v1231_v63  ;;  %v1712_v2 = vpop.f32.mrb[15].mxu0 }
 0x547   :  { %1864 = vtanh.f32 %v1235_v0  ;;  %v1236_v3 = vmul.f32 0.5, %v1232_v1 }
 0x549   :  { %1866 = vtanh.f32 %v1236_v3 }
 0x551   :  { %v1865_v4 = vpop.eup %1864 }
 0x552   :  { %v1239_v5 = vadd.f32 1.0, %v1865_v4 }
 0x553   :  { %v1867_v6 = vpop.eup %1866 }
 0x554   :  { %v1240_v38 = vadd.f32 1.0, %v1867_v6  ;;  %v1241_v7 = vmul.f32 0.5, %v1239_v5 }
 0x556   :  { %v1242_v8 = vmul.f32 0.5, %v1240_v38 }
 0x558   :  { %v1243_v9 = vpack.c.bf16 %v1242_v8, %v1241_v7 }
 0x55a   :  { %1730 = vmatmul.mubr.bf16.vlgmr.msra.gmra.mrb[16].mxu1 %v1243_v9 }
 0x62d   :  { %v1349_v11 = vpop.f32.mrb[16].mxu1 }
 0x62e   :  { %v1350_v12 = vadd.f32 %v1505_v10, %v1349_v11  ;;  %v1731_v13 = vpop.f32.mrb[17].mxu1 }
 0x62f   :  { %v1352_v14 = vpop.f32.mrb[18].mxu1 }
 0x630   :  { %v1356_v15 = vmul.f32 0.5, %v1350_v12  ;;  %v1353_v16 = vadd.f32 %v1505_v10, %v1352_v14  ;;  %v1732_v17 = vpop.f32.mrb[19].mxu1 }
 0x632   :  { %1868 = vtanh.f32 %v1356_v15  ;;  %v1357_v18 = vmul.f32 0.5, %v1353_v16 }
 0x634   :  { %1870 = vtanh.f32 %v1357_v18 }
 0x63c   :  { %v1869_v21 = vpop.eup %1868 }
 0x63d   :  { %v1360_v22 = vadd.f32 1.0, %v1869_v21 }
 0x63e   :  { %v1871_v23 = vpop.eup %1870 }
 0x63f   :  { %v1362_v24 = vmul.f32 0.5, %v1360_v22  ;;  %v1361_v25 = vadd.f32 1.0, %v1871_v23 }
 0x641   :  { %v1367_v26 = vsel %vm1366_vm2, %v1362_v24, -1e+30  ;;  %v1363_v27 = vmul.f32 0.5, %v1361_v25 }
 0x642   :  { %1369 = vmax.xlane.f32.xlu0 %v1367_v26 }
 0x643   :  { %v1368_v28 = vsel %vm1366_vm2, %v1363_v27, -1e+30 }
 0x646   :  { %1371 = vmax.xlane.f32.xlu0 %v1368_v28 }
 0x6cf   :  { %v1370_v29 = vpop.xlane.xlu0 %1369 }
 0x6d0   :  { %v1373_v30 = vsub.f32 %v1367_v26, %v1370_v29 }
 0x6d2   :  { %v1375_v31 = vmul.f32 1.442695, %v1373_v30 }
 0x6d3   :  { %v1372_v32 = vpop.xlane.xlu0 %1371 }
 0x6d4   :  { %v1374_v33 = vsub.f32 %v1368_v28, %v1372_v32  ;;  %1872 = vpow2.f32 %v1375_v31 }
 0x6d6   :  { %v1377_v34 = vmul.f32 1.442695, %v1374_v33 }
 0x6d8   :  { %1874 = vpow2.f32 %v1377_v34 }
 0x6de   :  { %v1873_v35 = vpop.eup %1872 }
 0x6df   :  { %1379 = vadd.xlane.f32.xlu1 %v1873_v35 }
 0x6e2   :  { %v1875_v36 = vpop.eup %1874 }
 0x6e3   :  { %1381 = vadd.xlane.f32.xlu1 %v1875_v36 }
 0x76c   :  { %v1380_v37 = vpop.xlane.xlu1 %1379 }
 0x76d   :  { %1876 = vlog2.f32 %v1380_v37 }
 0x770   :  { %v1382_v39 = vpop.xlane.xlu1 %1381 }
 0x771   :  { %1878 = vlog2.f32 %v1382_v39 }
 0x777   :  { %v1877_v40 = vpop.eup %1876 }
 0x778   :  { %v1384_v41 = vmul.f32 0.6931472, %v1877_v40 }
 0x77a   :  { %v1387_v42 = vsub.f32 %v1373_v30, %v1384_v41 }
 0x77b   :  { %v1879_v43 = vpop.eup %1878 }
 0x77c   :  { %1389 = vst [vmem:[#allocation14] sm:$0xff] %v1387_v42  ;;  %v1386_v44 = vmul.f32 0.6931472, %v1879_v43 }
 0x77e   :  { %v1388_v45 = vsub.f32 %v1374_v33, %v1386_v44 }
 0x780   :  { %1390 = vst [vmem:[#allocation14 + $0x8] sm:$0xff] %v1388_v45 }
 0x781   :  { %2045 = shalt.err (!%p2042_p4)
}
 0x782   :  { %s2046_s30 = scalar_lea.hbm %s2357_s13, 256 }
 0x783   :  { %p2047_p5 = scmp.ne.s32.totalorder %s2357_s13, %s2046_s30  ;;  %p2050_p6 = scmp.lt.u32.totalorder %s2046_s30, %s2357_s13 }
 0x785   :  { %p2052_p7 = pnand %p2050_p6, %p2047_p5 }
 0x787   :  { %2055 = shalt.err (!%p2052_p7)
}
 0x788   :  { %s2080_s20 = smov 128   ;;  %s2081_s21 = smov 8  }
 0x789   :  { %1402 = dma.vmem_to_hbm [thread:$0]  %s1397_s29, 256, %s2357_s13, [#allocation4], %s2080_s20, %s2080_s20, %s2081_s21  }
 0x78a   :  { %2064 = dma.done.wait [#allocation4], 256  }
 0x78b   :  { %2065 = vsyncadd [#allocation4], 4294967040 }
 0x78c   :  { %1406 = vsyncpa [#allocation3], 1 }
 0x78d   :  { %1407 = vsyncpa [#allocation6], 1 }
 0x78e   :  { %1408 = vsyncpa [#allocation9], 1 }
 0x78f   :  { %1409 = vsyncpa [#allocation12], 1 }
 0x790   :  { %1410 = vsyncpa [#allocation4], 1 }

</bundles_post_ra>
